<compile_context>
chip_gen: v7x
topology: tpu7x:2x2x1
jax: 0.10.0
libtpu: 0.0.40
codegen_flags: <defaults>
</compile_context>

<pallas_src>
import jax
import jax.numpy as jnp
from jax.experimental import pallas as pl
from jax.experimental.pallas import tpu as pltpu


def _replicate_kernel(in2_ref, out_ref):
    # in2_ref : (1, F) chunk of flattened input2 (block index constant along
    #           the copy axis -> stays resident, re-fetched only per F-chunk)
    # out_ref : (B, F) slab of the flattened stacked output
    out_ref[...] = jnp.broadcast_to(in2_ref[...], out_ref.shape)


def _plan_blocks(n, flat, itemsize):
    """Pick (B, F): rows-per-step and flattened-feature chunk size."""
    F_BUDGET = 256 * 1024          # max bytes of input2 chunk per block
    OUT_BUDGET = 2 * 1024 * 1024   # max bytes of one output block (pre double-buffer)

    # Feature-dim chunk: full flat if small, else a 128-aligned chunk.
    if flat * itemsize <= F_BUDGET:
        F = flat
    else:
        F = max(128, ((F_BUDGET // itemsize) // 128) * 128)

    # Copies per step.
    B0 = max(1, OUT_BUDGET // max(1, F * itemsize))
    if B0 >= n:
        B = n
    else:
        # Keep >=~4 grid steps along the copy axis (lets v7x shard across TCs).
        B = min(B0, max(1, n // 4))
        # Sublane-tiling rule: block's second-to-last dim must be a multiple
        # of 8 (or equal the full dim n, handled above).
        B = (B // 8) * 8
        if B == 0:
            B = n if n <= 8 else 8
    return B, F


def model_forward(input1, input2):
    """Returns an (n, *input2.shape) array; row i equals input2 (n = input1.shape[0])."""
    n = int(input1.shape[0])
    per_shape = tuple(input2.shape)
    dtype = input2.dtype

    flat = 1
    for d in per_shape:
        flat *= int(d)

    if n == 0 or flat == 0:
        return jnp.zeros((n,) + per_shape, dtype=dtype)

    itemsize = jnp.dtype(dtype).itemsize
    B, F = _plan_blocks(n, flat, itemsize)

    grid = (pl.cdiv(flat, F), pl.cdiv(n, B))  # feature chunks outer (slow),
                                              # copy axis inner (fast) so the
                                              # input block index only changes
                                              # once per feature chunk.

    # Explicit scoped-VMEM budget: double-buffered output + double-buffered
    # input chunk, 2x headroom. Stays well under v5e/v6e/v7x limits.
    vmem_needed = (2 * B * F + 2 * F) * itemsize
    vmem_limit = int(min(64 * 1024 * 1024, max(4 * 1024 * 1024, 2 * vmem_needed)))

    in2_flat = input2.reshape(1, flat)

    stacked_flat = pl.pallas_call(
        _replicate_kernel,
        out_shape=jax.ShapeDtypeStruct((n, flat), dtype),
        grid_spec=pltpu.PrefetchScalarGridSpec(
            num_scalar_prefetch=0,
            grid=grid,
            # input2 chunk: same block for every step along the copy axis.
            in_specs=[pl.BlockSpec((1, F), lambda j, i: (0, j))],
            # output: B copies x F features per grid step, lane-dense last dim.
            out_specs=pl.BlockSpec((B, F), lambda j, i: (i, j)),
        ),
        compiler_params=pltpu.CompilerParams(
            dimension_semantics=("parallel", "parallel"),
            vmem_limit_bytes=vmem_limit,
        ),
        cost_estimate=pl.CostEstimate(
            flops=0,
            transcendentals=0,
            bytes_accessed=(n * flat + flat) * itemsize,
        ),
    )(in2_flat)

    return stacked_flat.reshape((n,) + per_shape)


if __name__ == "__main__":
    key = jax.random.PRNGKey(0)
    k1, k2 = jax.random.split(key)
    input1 = jax.random.normal(k1, (2, 2), dtype=jnp.float32)
    input2 = jax.random.normal(k2, (2, 2), dtype=jnp.float32)

    stacked = model_forward(input1, input2)
    jax.block_until_ready(stacked)

    # Verify semantics: n slots, each equal to input2.
    n = input1.shape[0]
    assert stacked.shape == (n,) + tuple(input2.shape)
    for i in range(n):
        assert bool(jnp.allclose(stacked[i], input2))

    print("KERNEL_OK")
</pallas_src>

<mosaic_0001>
module attributes {stable_mosaic.version = 11 : i64} {
  func.func @_replicate_kernel(%arg0: i32, %arg1: i32, %arg2: memref<1x4xf32, #tpu.memory_space<vmem>>, %arg3: memref<2x4xf32, #tpu.memory_space<vmem>>) attributes {dimension_semantics = [#tpu.dimension_semantics<parallel>, #tpu.dimension_semantics<parallel>], iteration_bounds = array<i64: 1, 1>, scalar_prefetch = 0 : i64, scratch_operands = 0 : i64, tpu.core_type = #tpu.core_type<tc>, window_params = [{transform_indices = @transform_0, window_bounds = array<i64: 1, 4>}, {transform_indices = @transform_1, window_bounds = array<i64: 2, 4>}]} {
    %c0 = arith.constant 0 : index
    %c0_0 = arith.constant 0 : index
    %0 = vector.load %arg2[%c0, %c0_0] : memref<1x4xf32, #tpu.memory_space<vmem>>, vector<1x4xf32>
    %1 = vector.shape_cast %0 : vector<1x4xf32> to vector<1x4xf32>
    %2 = vector.broadcast %1 : vector<1x4xf32> to vector<2x4xf32>
    %c0_1 = arith.constant 0 : index
    %c0_2 = arith.constant 0 : index
    %3 = vector.load %arg3[%c0_1, %c0_2] : memref<2x4xf32, #tpu.memory_space<vmem>>, vector<2x4xf32>
    tpu.vector_store %arg3[%c0_1, %c0_2], %2 {strides = array<i32>} : memref<2x4xf32, #tpu.memory_space<vmem>>, vector<2x4xf32>,
    return
  }
  func.func @transform_0(%arg0: i32, %arg1: i32) -> (i32, i32) {
    %c0_i32 = arith.constant 0 : i32
    %c0_i32_0 = arith.constant 0 : i32
    return %c0_i32, %arg0 : i32, i32
  }
  func.func @transform_1(%arg0: i32, %arg1: i32) -> (i32, i32) {
    %c0_i32 = arith.constant 0 : i32
    return %arg1, %arg0 : i32, i32
  }
}

</mosaic_0001>

<bundles_post_ra>
// kernel: tpu_custom_call.1
= control target key start
LH: loop header
LB: loop body
LE: loop exit
PB: predicated region body
PF: predicated region fallthrough
CT: control target
= control target key end

     0   :  { %6 = vsyncpa [#allocation3], 0  ;;  %s132_s0 = inlined_call_operand.hbm [shape: f32[1,4], index: 0, kind: input, shape index: {}]   ;;  %s133_s1 = inlined_call_operand.hbm [shape: f32[2,4], index: 1, kind: output, shape index: {}]  }
   0x1   :  { %7 = vsyncpa [#allocation4], 0  ;;  %s96_s6 = smov [#allocation2]   ;;  %s48_s10 = scalar_lea.hbm %s132_s0, 16 }
   0x2   :  { %s14_s7 = sshll.u32 %s96_s6, 4  ;;  %p49_p0 = scmp.ne.s32.totalorder %s132_s0, %s48_s10  ;;  %s15_s7 = int_to_ptr.vmem [resolvable:$true] %s14_s7 }
   0x3   :  { %p52_p1 = scmp.lt.u32.totalorder %s48_s10, %s132_s0 }
   0x5   :  { %p54_p2 = pnand %p52_p1, %p49_p0 }
   0x7   :  { %57 = shalt.err (!%p54_p2)
}
   0x8   :  { %s58_s15 = scalar_lea.vmem %s15_s7, 16  ;;  %s62_s16 = scalar_lea.vmem %s15_s7, 32 }
   0x9   :  { %p59_p3 = scmp.ne.s32.totalorder %s15_s7, %s58_s15  ;;  %p63_p4 = scmp.lt.s32.totalorder %s15_s7, %s15_s7 }
   0xa   :  { %p64_p5 = scmp.lt.s32.totalorder %s62_s16, %s58_s15 }
   0xc   :  { %p65_p6 = por %p64_p5, %p63_p4 }
   0xe   :  { %p66_p7 = pnand %p65_p6, %p59_p3 }
  0x10   :  { %69 = shalt.err (!%p66_p7)
}
  0x11   :  { %17 = dma.hbm_to_vmem [thread:$0]  %s132_s0, 16, %s15_s7, [#allocation3]  }
  0x12   :  { %92 = dma.done.wait [#allocation3], 16  }
  0x13   :  { %93 = vsyncadd [#allocation3], 4294967280  ;;  %s97_s19 = smov [#allocation5]   ;;  %vm28_vm0 = vcmask 25600   ;;  %v45_v0 = vld [vmem:[#allocation2] ss:$0 sm:$0xff] }
  0x14   :  { %s36_s20 = sshll.u32 %s97_s19, 4  ;;  %29 = vst.msk [vmem:[#allocation5] sm:$0x3] %vm28_vm0, %v45_v0  ;;  %s37_s20 = int_to_ptr.vmem [resolvable:$true] %s36_s20 }
  0x15   :  { %s70_s21 = scalar_lea.vmem %s37_s20, 32  ;;  %p75_p9 = scmp.lt.s32.totalorder %s37_s20, %s37_s20 }
  0x16   :  { %p71_p8 = scmp.ne.s32.totalorder %s37_s20, %s70_s21  ;;  %p76_p10 = scmp.lt.s32.totalorder %s70_s21, %s70_s21 }
  0x18   :  { %p77_p11 = por %p76_p10, %p75_p9 }
  0x1a   :  { %p78_p12 = pnand %p77_p11, %p71_p8 }
  0x1c   :  { %81 = shalt.err (!%p78_p12)
}
  0x1d   :  { %s82_s24 = scalar_lea.hbm %s133_s1, 32 }
  0x1e   :  { %p83_p13 = scmp.ne.s32.totalorder %s133_s1, %s82_s24  ;;  %p86_p0 = scmp.lt.u32.totalorder %s82_s24, %s133_s1 }
  0x20   :  { %p88_p1 = pnand %p86_p0, %p83_p13 }
  0x22   :  { %91 = shalt.err (!%p88_p1)
}
  0x23   :  { %39 = dma.vmem_to_hbm [thread:$0]  %s37_s20, 32, %s133_s1, [#allocation4]  }
  0x24   :  { %94 = dma.done.wait [#allocation4], 32  }
  0x25   :  { %95 = vsyncadd [#allocation4], 4294967264 }
  0x26   :  { %43 = vsyncpa [#allocation3], 1 }
  0x27   :  { %44 = vsyncpa [#allocation4], 1 }

</bundles_post_ra>
